<compile_context>
chip_gen: v6e
topology: v6e:2x2x1
jax: 0.10.0
libtpu: 0.0.40
codegen_flags: <defaults>
</compile_context>

<pallas_src>
import math
import functools

import jax
import jax.numpy as jnp
from jax.experimental import pallas as pl
from jax.experimental.pallas import tpu as pltpu


def attention_kernel(h_ref, w_ref, b_ref, o_ref, *, dq, dk, dv):
    # h_ref: (Bb, S, dm) block (bf16); w_ref: (dm, dq+dk+dv) packed weights
    # (bf16, Q columns pre-scaled by 1/sqrt(dk)); b_ref: (1, dq+dk+dv) packed
    # bias (f32, bq pre-scaled); o_ref: (Bb, S, dv).
    Bb, S, dm = h_ref.shape

    # Fused QKV projection: one (Bb*S, dm) @ (dm, dq+dk+dv) MXU matmul,
    # bf16 operands, f32 accumulate (matches torch Linear: y = x @ W.T + b).
    h = h_ref[...]
    if h.dtype != jnp.bfloat16:           # trace-time branch; demo streams bf16
        h = h.astype(jnp.bfloat16)
    h2 = h.reshape(Bb * S, dm)            # Bb*S kept a multiple of 8 (sublane)
    qkv = jnp.dot(h2, w_ref[...], preferred_element_type=jnp.float32)
    qkv = (qkv + b_ref[...]).reshape(Bb, S, dq + dk + dv)

    # Static, lane-aligned splits (dq/dk/dv asserted multiples of 128).
    q = qkv[:, :, :dq]                    # already carries the 1/sqrt(dk) scale
    k = qkv[:, :, dq:dq + dk]
    v = qkv[:, :, dq + dk:]

    # scores = K @ (Q*scale)^T : batched contraction on the feature dim, same
    # ordering as torch.matmul(K, Q.transpose(-1, -2)) / sqrt(dk).
    scores = jnp.einsum(
        "bkd,bqd->bkq", k.astype(jnp.bfloat16), q.astype(jnp.bfloat16),
        preferred_element_type=jnp.float32)                       # (Bb, S, S)

    # Numerically stable softmax, normalization deferred past the P@V matmul.
    scores = scores - jnp.max(scores, axis=-1, keepdims=True)
    p = jnp.exp(scores)                                           # unnormalized
    denom = jnp.sum(p, axis=-1, keepdims=True)                    # (Bb, S, 1) f32

    # out = (exp(scores) @ V) * 1/rowsum  -- S*dv VPU muls instead of S^2.
    out = jnp.einsum(
        "bij,bjd->bid", p.astype(jnp.bfloat16), v.astype(jnp.bfloat16),
        preferred_element_type=jnp.float32)                       # (Bb, S, dv)
    out = out * pl.reciprocal(denom, approx=True)                 # EUP slot
    o_ref[...] = out.astype(o_ref.dtype)


def _pick_block_batch(B, S, target_rows=256, min_grid_steps=2):
    """Largest divisor Bb of B with Bb*S <= target_rows, preferring
    sublane-aligned (Bb*S % 8 == 0) flattening, while leaving at least
    `min_grid_steps` grid steps when B allows (keeps both v7x TCs busy)."""
    max_bb = B if B < min_grid_steps else B // min_grid_steps
    max_bb = max(1, max_bb)
    candidates = [bb for bb in range(max_bb, 0, -1)
                  if B % bb == 0 and bb * S <= target_rows]
    if not candidates:
        candidates = [1]
    for bb in candidates:                 # prefer free (8,128)-aligned reshape
        if (bb * S) % 8 == 0:
            return bb
    return candidates[0]


def pack_attention_params(wq_t, bq, wk_t, bk, wv_t, bv, *, dk):
    """One-time packing: concat Wq/Wk/Wv (pre-transposed, (dm, d*)) into a
    single bf16 weight and f32 bias, with 1/sqrt(dk) folded into the Q slice.
    Call once at init — NOT on every forward."""
    dq, dkp, dv = wq_t.shape[1], wk_t.shape[1], wv_t.shape[1]
    assert dkp == dk, f"scale dk ({dk}) must match wk_t.shape[1] ({dkp})"
    for d in (dq, dkp, dv):
        assert d % 128 == 0, "dq/dk/dv must be multiples of 128 (lane-aligned)"
    scale = 1.0 / math.sqrt(dk)
    w_packed = jnp.concatenate(
        [wq_t * scale, wk_t, wv_t], axis=1).astype(jnp.bfloat16)
    b_packed = jnp.concatenate(
        [jnp.reshape(bq, (1, dq)) * scale,
         jnp.reshape(bk, (1, dkp)),
         jnp.reshape(bv, (1, dv))], axis=1).astype(jnp.float32)
    return w_packed, b_packed, (dq, dkp, dv)


def attention_layer(h_a, w_packed, b_packed, dims, *, out_dtype=jnp.float32):
    """h_a: (B, S, dm); w_packed/b_packed from pack_attention_params."""
    B, S, dm = h_a.shape
    dq, dk, dv = dims
    d_all = dq + dk + dv
    assert w_packed.shape == (dm, d_all)
    assert b_packed.shape == (1, d_all)

    # Stream bf16 activations (halves per-step DMA bytes). Ideally the caller
    # passes bf16 so this cast never touches HBM inside the forward path.
    if h_a.dtype != jnp.bfloat16:
        h_a = h_a.astype(jnp.bfloat16)

    Bb = _pick_block_batch(B, S)
    grid = (B // Bb,)

    kernel = functools.partial(attention_kernel, dq=dq, dk=dk, dv=dv)

    return pl.pallas_call(
        kernel,
        out_shape=jax.ShapeDtypeStruct((B, S, dv), out_dtype),
        grid=grid,
        in_specs=[
            pl.BlockSpec((Bb, S, dm), lambda b: (b, 0, 0)),   # activations
            pl.BlockSpec((dm, d_all), lambda b: (0, 0)),      # packed W^T (resident)
            pl.BlockSpec((1, d_all), lambda b: (0, 0)),       # packed bias (resident)
        ],
        out_specs=pl.BlockSpec((Bb, S, dv), lambda b: (b, 0, 0)),
        compiler_params=pltpu.CompilerParams(
            dimension_semantics=("parallel",),
            vmem_limit_bytes=48 * 1024 * 1024,   # safe on v7x's 64 MiB VMEM too
        ),
    )(h_a, w_packed, b_packed)


def attention_layer_ref(h_a, wq_t, bq, wk_t, bk, wv_t, bv, *, dk):
    """Plain-JAX f32 reference mirroring the PyTorch forward."""
    V = h_a @ wv_t + bv
    K = h_a @ wk_t + bk
    Q = h_a @ wq_t + bq
    scores = jnp.einsum("bid,bjd->bij", K, Q) / jnp.sqrt(jnp.float32(dk))
    p = jax.nn.softmax(scores, axis=-1)
    return jnp.einsum("bij,bjd->bid", p, V)


if __name__ == "__main__":
    # Small but tile-friendly shapes: dm = dk = dq = dv = 128 (module default),
    # batch = 2, seq = 8.
    B, S = 2, 8
    dm = dk = dq = dv = 128

    key = jax.random.PRNGKey(0)
    k_h, k_wq, k_bq, k_wk, k_bk, k_wv, k_bv = jax.random.split(key, 7)

    h_a = jax.random.normal(k_h, (B, S, dm), dtype=jnp.float32)

    # Deterministic parameter init, emulating nn.Linear's uniform(-1/sqrt(dm), 1/sqrt(dm)).
    lim = 1.0 / math.sqrt(dm)
    init = lambda k, shape: jax.random.uniform(k, shape, jnp.float32, -lim, lim)

    # Stored pre-transposed: (dm, out) so kernel does x @ W_t (== x @ W.T in torch).
    wq_t = init(k_wq, (dm, dq))
    bq = init(k_bq, (1, dq))
    wk_t = init(k_wk, (dm, dk))
    bk = init(k_bk, (1, dk))
    wv_t = init(k_wv, (dm, dv))
    bv = init(k_bv, (1, dv))

    # One-time pack (init-time), not per-forward.
    w_packed, b_packed, dims = pack_attention_params(
        wq_t, bq, wk_t, bk, wv_t, bv, dk=dk)

    # Cast activations once upstream; kernel then streams bf16.
    h_a_bf16 = h_a.astype(jnp.bfloat16)

    out = attention_layer(h_a_bf16, w_packed, b_packed, dims)
    out = jax.block_until_ready(out)

    ref = attention_layer_ref(h_a, wq_t, bq, wk_t, bk, wv_t, bv, dk=dk)
    assert out.shape == (B, S, dv), out.shape
    # bf16 MXU operands + approx reciprocal -> loosened tolerance vs. f32 reference.
    assert jnp.allclose(out, ref, atol=3e-2, rtol=3e-2), "mismatch vs JAX reference"

    print("KERNEL_OK")
</pallas_src>

<mosaic_0001>
module attributes {stable_mosaic.version = 11 : i64} {
  func.func @attention_kernel(%arg0: i32, %arg1: memref<1x8x128xbf16, #tpu.memory_space<vmem>>, %arg2: memref<128x384xbf16, #tpu.memory_space<vmem>>, %arg3: memref<1x384xf32, #tpu.memory_space<vmem>>, %arg4: memref<1x8x128xf32, #tpu.memory_space<vmem>>) attributes {dimension_semantics = [#tpu.dimension_semantics<parallel>], iteration_bounds = array<i64: 2>, scalar_prefetch = 0 : i64, scratch_operands = 0 : i64, tpu.core_type = #tpu.core_type<tc>, window_params = [{transform_indices = @transform_0, window_bounds = array<i64: 1, 8, 128>}, {pipeline_mode = #tpu.pipeline_mode<synchronous>, transform_indices = @transform_1, window_bounds = array<i64: 128, 384>}, {pipeline_mode = #tpu.pipeline_mode<synchronous>, transform_indices = @transform_2, window_bounds = array<i64: 1, 384>}, {transform_indices = @transform_3, window_bounds = array<i64: 1, 8, 128>}]} {
    %c0 = arith.constant 0 : index
    %c0_0 = arith.constant 0 : index
    %c0_1 = arith.constant 0 : index
    %0 = vector.load %arg1[%c0, %c0_0, %c0_1] : memref<1x8x128xbf16, #tpu.memory_space<vmem>>, vector<1x8x128xbf16>
    %1 = vector.shape_cast %0 : vector<1x8x128xbf16> to vector<8x128xbf16>
    %c0_2 = arith.constant 0 : index
    %c0_3 = arith.constant 0 : index
    %2 = vector.load %arg2[%c0_2, %c0_3] : memref<128x384xbf16, #tpu.memory_space<vmem>>, vector<128x384xbf16>
    %cst = arith.constant dense<0.000000e+00> : vector<8x384xf32>
    %3 = tpu.matmul %1, %2, %cst {dimension_numbers = #tpu.dot_dimension_numbers<[1], [0], [0], [1], [0, 0, 1, 1], [], []>} : vector<8x128xbf16>, vector<128x384xbf16>, vector<8x384xf32> -> vector<8x384xf32>
    %c0_4 = arith.constant 0 : index
    %c0_5 = arith.constant 0 : index
    %4 = vector.load %arg3[%c0_4, %c0_5] : memref<1x384xf32, #tpu.memory_space<vmem>>, vector<1x384xf32>
    %5 = vector.broadcast %4 : vector<1x384xf32> to vector<8x384xf32>
    %6 = arith.addf %3, %5 : vector<8x384xf32>
    %7 = vector.shape_cast %6 : vector<8x384xf32> to vector<1x8x384xf32>
    %8 = vector.extract_strided_slice %7 {offsets = [0, 0, 0], sizes = [1, 8, 128], strides = [1, 1, 1]} : vector<1x8x384xf32> to vector<1x8x128xf32>
    %9 = vector.extract_strided_slice %7 {offsets = [0, 0, 128], sizes = [1, 8, 128], strides = [1, 1, 1]} : vector<1x8x384xf32> to vector<1x8x128xf32>
    %10 = vector.extract_strided_slice %7 {offsets = [0, 0, 256], sizes = [1, 8, 128], strides = [1, 1, 1]} : vector<1x8x384xf32> to vector<1x8x128xf32>
    %11 = arith.truncf %9 : vector<1x8x128xf32> to vector<1x8x128xbf16>
    %12 = arith.truncf %8 : vector<1x8x128xf32> to vector<1x8x128xbf16>
    "tpu.trace_start"() <{level = 10 : i32, message = "bkd,bqd->bkq"}> : () -> ()
    %cst_6 = arith.constant dense<0.000000e+00> : vector<1x8x8xf32>
    %13 = tpu.matmul %11, %12, %cst_6 {dimension_numbers = #tpu.dot_dimension_numbers<[2], [2], [1], [1], [0, 0, 0, 1, 1, 1], [0], [0]>} : vector<1x8x128xbf16>, vector<1x8x128xbf16>, vector<1x8x8xf32> -> vector<1x8x8xf32>
    "tpu.trace_stop"() : () -> ()
    %cst_7 = arith.constant dense<0xFF800000> : vector<1x8xf32>
    %14 = vector.multi_reduction <maximumf>, %13, %cst_7 [2] : vector<1x8x8xf32> to vector<1x8xf32>
    %15 = vector.shape_cast %14 : vector<1x8xf32> to vector<1x8x1xf32>
    %16 = vector.broadcast %15 : vector<1x8x1xf32> to vector<1x8x8xf32>
    %17 = arith.subf %13, %16 : vector<1x8x8xf32>
    %18 = math.exp %17 : vector<1x8x8xf32>
    %cst_8 = arith.constant dense<0.000000e+00> : vector<1x8xf32>
    %19 = vector.multi_reduction <add>, %18, %cst_8 [2] : vector<1x8x8xf32> to vector<1x8xf32>
    %20 = vector.shape_cast %19 : vector<1x8xf32> to vector<1x8x1xf32>
    %21 = arith.truncf %18 : vector<1x8x8xf32> to vector<1x8x8xbf16>
    %22 = arith.truncf %10 : vector<1x8x128xf32> to vector<1x8x128xbf16>
    "tpu.trace_start"() <{level = 10 : i32, message = "bij,bjd->bid"}> : () -> ()
    %cst_9 = arith.constant dense<0.000000e+00> : vector<1x8x128xf32>
    %23 = tpu.matmul %21, %22, %cst_9 {dimension_numbers = #tpu.dot_dimension_numbers<[2], [1], [1], [2], [0, 0, 0, 1, 1, 2], [0], [0]>} : vector<1x8x8xbf16>, vector<1x8x128xbf16>, vector<1x8x128xf32> -> vector<1x8x128xf32>
    "tpu.trace_stop"() : () -> ()
    %24 = tpu.reciprocal %20 {approx = true} : vector<1x8x1xf32> -> vector<1x8x1xf32>
    %25 = vector.broadcast %24 : vector<1x8x1xf32> to vector<1x8x128xf32>
    %26 = arith.mulf %23, %25 : vector<1x8x128xf32>
    %c0_10 = arith.constant 0 : index
    %c0_11 = arith.constant 0 : index
    %c0_12 = arith.constant 0 : index
    %27 = vector.load %arg4[%c0_10, %c0_11, %c0_12] : memref<1x8x128xf32, #tpu.memory_space<vmem>>, vector<1x8x128xf32>
    tpu.vector_store %arg4[%c0_10, %c0_11, %c0_12], %26 {strides = array<i32>} : memref<1x8x128xf32, #tpu.memory_space<vmem>>, vector<1x8x128xf32>,
    return
  }
  func.func @transform_0(%arg0: i32) -> (i32, i32, i32) {
    %c0_i32 = arith.constant 0 : i32
    %c0_i32_0 = arith.constant 0 : i32
    %c0_i32_1 = arith.constant 0 : i32
    return %arg0, %c0_i32, %c0_i32_0 : i32, i32, i32
  }
  func.func @transform_1(%arg0: i32) -> (i32, i32) {
    %c0_i32 = arith.constant 0 : i32
    %c0_i32_0 = arith.constant 0 : i32
    %c0_i32_1 = arith.constant 0 : i32
    return %c0_i32, %c0_i32_0 : i32, i32
  }
  func.func @transform_2(%arg0: i32) -> (i32, i32) {
    %c0_i32 = arith.constant 0 : i32
    %c0_i32_0 = arith.constant 0 : i32
    %c0_i32_1 = arith.constant 0 : i32
    return %c0_i32, %c0_i32_0 : i32, i32
  }
  func.func @transform_3(%arg0: i32) -> (i32, i32, i32) {
    %c0_i32 = arith.constant 0 : i32
    %c0_i32_0 = arith.constant 0 : i32
    %c0_i32_1 = arith.constant 0 : i32
    return %arg0, %c0_i32, %c0_i32_0 : i32, i32, i32
  }
}

</mosaic_0001>

<bundles_post_ra>
// kernel: tpu_custom_call.1
= control target key start
LH: loop header
LB: loop body
LE: loop exit
PB: predicated region body
PF: predicated region fallthrough
CT: control target
= control target key end

     0   :  { %8 = vsyncpa [#allocation3], 0  ;;  %s1172_s0 = inlined_call_operand.hbm [shape: bf16[2,8,128], index: 0, kind: input, shape index: {}]   ;;  %s1173_s1 = inlined_call_operand.hbm [shape: bf16[128,384], index: 1, kind: input, shape index: {}]   ;;  %s1174_s2 = inlined_call_operand.vmem [shape: f32[1,384], index: 2, kind: input, shape index: {}]   ;;  %s1175_s3 = inlined_call_operand.hbm [shape: f32[2,8,128], index: 3, kind: output, shape index: {}]  }
   0x1   :  { %10 = vsyncpa [#allocation3 + $0x1], 0 }
   0x2   :  { %11 = vsyncpa [#allocation6], 0 }
   0x3   :  { %12 = vsyncpa [#allocation4], 0 }
   0x4   :  { %14 = vsyncpa [#allocation4 + $0x1], 0  ;;  %s993_s12 = smov 0   ;;  %s995_s13 = smov 0  }
   0x5   :  { %s997_s14 = smov 0   ;;  %s999_s15 = smov 0  }
   0x6 LB: > { %s1014_s16 = sadd.s32 4294967295, %s963_s15   ;;  %s659_s17 = sadd.s32 4294967294, %s963_s15   ;;  %s963_s15 = sphi %s999_s15, %s1197_s15   ;;  %s959_s14 = sphi %s997_s14, %s1196_s14   ;;  %s955_s13 = sphi %s995_s13, %s1195_s13   ;;  %s951_s12 = sphi %s993_s12, %s1194_s12  }
   0x7   : > { %p40_p0 = scmp.ne.s32.totalorder %s955_s13, %s951_s12  ;;  %p1176_p1 = scmp.eq.s32.totalorder %s1014_s16, 0 }
   0x8   : > { %p112_p3 = scmp.eq.s32.totalorder %s659_s17, 1  ;;  %p660_p5 = scmp.ge.s32.totalorder %s963_s15, 1 }
   0x9   : > { %p1023_p4 = por %p1176_p1, %p40_p0  ;;  %p119_p7 = scmp.lt.s32.totalorder %s963_s15, 3 }
   0xa   : > { %p1028_p6 = por %p112_p3, %p40_p0  ;;  %s965_s21 = smov [#allocation5]  }
   0xb   : > { %s1180_s18 = scalar_select %p1023_p4, 1, 0 }
   0xc   : > { %s1181_s19 = scalar_select %p1028_p6, 1, 0 }
   0xd   : > { %p1033_p8 = pnand %p660_p5, %p119_p7  ;;  %s131_s22 = sshll.u32 %s965_s21, 4  ;;  %s132_s22 = int_to_ptr.vmem [resolvable:$true] %s131_s22 }
   0xe   : > { %s1047_s24 = sadd.s32 1, %s963_s15   ;;  %s27_s25 = sadd.s32 1, %s959_s14 }
   0xf   : > { %s1182_s20 = scalar_select %p1033_p8, 1, 0 }
  0x10   : > { %p751_p9 = pneg %p1033_p8  ;;  %s24_s26 = ssub.s32 %s963_s15, %s1047_s24 }
  0x11   : > { %s852_s27 = scalar_lea.vmem %s132_s22, 3072  ;;  %p860_p5 = scmp.lt.s32.totalorder %s132_s22, %s132_s22 }
  0x12   : > { %p1042_p11 = pnand %p751_p9, %p1176_p1  ;;  %p853_p13 = scmp.ne.s32.totalorder %s132_s22, %s852_s27 }
  0x13   : > { %p861_p7 = scmp.lt.s32.totalorder %s852_s27, %s852_s27 }
  0x14   : > { %p843_p12 = pneg %p1042_p11 }
  0x15   : > { %p862_p10 = por %p861_p7, %p860_p5 }
  0x16   : > { %p855_p0 = pnand %p853_p13, %p843_p12 }
  0x18   : > { %p856_p3 = pneg %p855_p0 }
  0x1a   : > { %p863_p2 = pnand %p862_p10, %p856_p3 }
  0x1c   : > { %866 = shalt.err (!%p863_p2)
}
  0x1d   : > { %s966_s28 = smov 192   ;;  %s967_s29 = smov 12  }
  0x1e   : > { %754 = dma.hbm_to_vmem [thread:$0]  (!%p1042_p11), %s1173_s1, 3072, %s132_s22, [#allocation6], %s966_s28, %s966_s28, %s967_s29  }
  0x1f   : > { %p25_p9 = scmp.eq.s32.totalorder %s24_s26, 0  ;;  %p34_p12 = scmp.ne.s32.totalorder %s959_s14, %s955_s13 }
  0x20   : > { %p35_p10 = scmp.eq.s32.totalorder %s963_s15, 0  ;;  %p764_p2 = scmp.lt.s32.totalorder %s963_s15, 2 }
  0x21   : > { %s1064_s5 = scalar_select %p25_p9, %s959_s14, %s27_s25  }
  0x22   : > { %p36_p13 = por %p35_p10, %p34_p12  ;;  %p1184_p0 = scmp.eq.s32.totalorder %s1014_s16, 1 }
  0x23   : > { %s148_s7 = sand.u32 1, %s959_s14   ;;  %s664_s8 = sshll.u32 %s963_s15, 6 }
  0x24   : > { %p1068_p3 = por %p1184_p0, %p34_p12  ;;  %s663_s9 = sshll.u32 %s148_s7, 2 }
  0x25   : > { %s1077_s17 = scalar_lea.hbm %s1172_s0, %s664_s8  ;;  %s152_s21 = scalar_lea.vmem [#allocation2], %s663_s9 }
  0x26   : > { %s1185_s6 = scalar_select %p1068_p3, 1, 0 }
  0x27   : > { %s159_s22 = sshll.u32 %s152_s21, 4  ;;  %p1079_p11 = pnand %p764_p2, %p36_p13  ;;  %s160_s22 = int_to_ptr.vmem [resolvable:$true] %s159_s22 }
  0x28   : > { %s149_s25 = scalar_lea.sflag [#allocation3], %s148_s7  ;;  %s867_s26 = scalar_lea.hbm %s1077_s17, 64 }
  0x29   : > { %p868_p5 = scmp.ne.s32.totalorder %s1077_s17, %s867_s26  ;;  %p869_p7 = pneg %p1079_p11 }
  0x2a   : > { %s872_s29 = scalar_lea.hbm %s1172_s0, 128  ;;  %p873_p10 = scmp.lt.s32.totalorder %s1077_s17, %s1172_s0 }
  0x2b   : > { %p870_p9 = pnand %p869_p7, %p868_p5  ;;  %p874_p2 = scmp.lt.s32.totalorder %s872_s29, %s867_s26 }
  0x2d   : > { %p871_p12 = pneg %p870_p9  ;;  %p875_p13 = por %p874_p2, %p873_p10 }
  0x2f   : > { %p876_p0 = pnand %p875_p13, %p871_p12 }
  0x31   : > { %879 = shalt.err (!%p876_p0)
}
  0x32   : > { %s880_s8 = scalar_lea.vmem %s160_s22, 64  ;;  %s968_s7 = smov [#allocation2]  }
  0x33   : > { %p881_p1 = scmp.ne.s32.totalorder %s160_s22, %s880_s8  ;;  %s885_s9 = sshll.u32 %s968_s7, 4  ;;  %s886_s9 = int_to_ptr.vmem [resolvable:$false] %s885_s9 }
  0x34   : > { %s887_s10 = scalar_lea.vmem %s886_s9, 128  ;;  %p888_p5 = scmp.lt.s32.totalorder %s160_s22, %s886_s9 }
  0x35   : > { %p883_p6 = pnand %p881_p1, %p869_p7  ;;  %p889_p9 = scmp.lt.s32.totalorder %s887_s10, %s880_s8 }
  0x37   : > { %p884_p3 = pneg %p883_p6  ;;  %p890_p4 = por %p889_p9, %p888_p5 }
  0x39   : > { %p891_p8 = pnand %p890_p4, %p884_p3 }
  0x3b   : > { %894 = shalt.err (!%p891_p8)
}
  0x3c   : > { %758 = dma.hbm_to_vmem [thread:$0]  (!%p1079_p11), %s1077_s17, 64, %s160_s22, %s149_s25  }
  0x3d   : > { %p1187_p12 = scmp.ne.s32.totalorder %s1182_s20, 0 }
  0x3e   : > { %s1100_s11 = sand.u32 (!%p1187_p12), 1, %s955_s13   ;;  %p1188_p1 = scmp.ne.s32.totalorder (!%p1187_p12), %s1180_s18, 0 }
  0x3f   : > { %168 = sbr.rel (%p1187_p12) target bundleno = 870 (0x366), region = 32  ;;  %s666_s21 = sshll.u32 (!%p1187_p12), %s1100_s11, 2 }
  0x40   : > { %s171_s26 = scalar_lea.sflag (!%p1187_p12), [#allocation3], %s1100_s11  ;;  %s1104_s27 = scalar_lea.vmem (!%p1187_p12), [#allocation2], %s666_s21 }
  0x44   : > { %938 = dma.done.wait (%p1188_p1), %s171_s26, 64  }
  0x45   : > { %940 = vsyncadd (%p1188_p1), %s171_s26, 4294967232  ;;  %p1189_p4 = scmp.eq.s32.totalorder %s1014_s16, 0 }
  0x47   : > { %942 = dma.done.wait (%p1189_p4), [#allocation6], 3072   ;;  %p1190_p6 = pmov %p1189_p4 }
  0x48   : > { %v969_v0 = vmov 0   ;;  %v805_v1 = vld [vmem:[#allocation5 + $0xac] ss:$12 sps:$4 sm:$0xff]   ;;  %v807_v2 = vld [vmem:[#allocation5 + $0xa8] ss:$12 sps:$4 sm:$0xff]   ;;  %v970_v18 = vmov 0.0   ;;  %v237_v27 = vlaneseq }
  0x49   : > { %944 = vsyncadd (%p1190_p6), [#allocation6], 4294964224  ;;  %412 = vmatprep.mubr.bf16.mxu0 %v969_v0  ;;  %380 = vmatprep.subr.bf16.mxu0 %v805_v1  ;;  %v808_v3 = vld [vmem:[#allocation5 + $0x94] ss:$12 sps:$4 sm:$0xff]   ;;  %v810_v4 = vld [vmem:[#allocation5 + $0x90] ss:$12 sps:$4 sm:$0xff]  }
  0x4a   : > { %381 = vmatpush1.bf16.msra.mxu0 %v807_v2  ;;  %v811_v5 = vld [vmem:[#allocation5 + $0x7c] ss:$12 sps:$4 sm:$0xff]   ;;  %v813_v6 = vld [vmem:[#allocation5 + $0x78] ss:$12 sps:$4 sm:$0xff]   ;;  %v816_v8 = vld [vmem:[#allocation5 + $0x60] ss:$12 sps:$4 sm:$0xff]   ;;  %711 = vmatprep.subr.bf16.mxu1 %v970_v18 }
  0x4b   : > { %382 = vmatprep.subr.bf16.mxu0 %v808_v3  ;;  %v814_v7 = vld [vmem:[#allocation5 + $0x64] ss:$12 sps:$4 sm:$0xff]   ;;  %v817_v9 = vld [vmem:[#allocation5 + $0x4c] ss:$12 sps:$4 sm:$0xff]   ;;  %v819_v10 = vld [vmem:[#allocation5 + $0x48] ss:$12 sps:$4 sm:$0xff]  }
  0x4c   : > { %v820_v11 = vld [vmem:[#allocation5 + $0x34] ss:$12 sps:$4 sm:$0xff]   ;;  %v822_v12 = vld [vmem:[#allocation5 + $0x30] ss:$12 sps:$4 sm:$0xff]   ;;  %v825_v14 = vld [vmem:[#allocation5 + $0x18] ss:$12 sps:$4 sm:$0xff]  }
  0x4d   : > { %v823_v13 = vld [vmem:[#allocation5 + $0x1c] ss:$12 sps:$4 sm:$0xff]   ;;  %v826_v15 = vld [vmem:[#allocation5 + $0x4] ss:$12 sps:$4 sm:$0xff]   ;;  %v828_v16 = vld [vmem:[#allocation5] ss:$12 sps:$4 sm:$0xff]  }
  0x4e   : > { %383 = vmatpush1.bf16.msra.mxu0 %v810_v4  ;;  %v202_v17 = vld [vmem:[%s1104_s27] sm:$0xf]  ;;  %vm971_vm0 = vmmov 0   ;;  %v831_v21 = vld [vmem:[#allocation5 + $0x80] ss:$12 sps:$4 sm:$0xff]   ;;  %v238_v28 = vshrl.u32 %v237_v27, 7 }
  0x4f   : > { %384 = vmatprep.subr.bf16.mxu0 %v811_v5  ;;  %727 = vmatprep.mubr.msk.bf16.mxu1 %vm971_vm0, %v970_v18  ;;  %v829_v19 = vld [vmem:[#allocation5 + $0xb0] ss:$12 sps:$4 sm:$0xff]   ;;  %v830_v20 = vld [vmem:[#allocation5 + $0x98] ss:$12 sps:$4 sm:$0xff]   ;;  %v832_v22 = vld [vmem:[#allocation5 + $0x68] ss:$12 sps:$4 sm:$0xff]  }
  0x50   : > { %712 = vmatpush3.bf16.msra.mxu1 %v829_v19  ;;  %v833_v23 = vld [vmem:[#allocation5 + $0x50] ss:$12 sps:$4 sm:$0xff]   ;;  %v834_v24 = vld [vmem:[#allocation5 + $0x38] ss:$12 sps:$4 sm:$0xff]   ;;  %v835_v25 = vld [vmem:[#allocation5 + $0x20] ss:$12 sps:$4 sm:$0xff]  }
  0x51   : > { %713 = vmatprep.subr.bf16.mxu1 %v970_v18  ;;  %v836_v26 = vld [vmem:[#allocation5 + $0x8] ss:$12 sps:$4 sm:$0xff]   ;;  %v239_v29 = vsub.s32 0, %v238_v28  ;;  %v235_v30 = vld [vmem:[%s1174_s2] sm:$0x7]  ;;  %v243_v32 = vsub.s32 1, %v238_v28 }
  0x52   : > { %385 = vmatpush1.bf16.msra.mxu0 %v813_v6  ;;  %vm503_vm1 = vcmask 64512   ;;  %v247_v47 = vsub.s32 2, %v238_v28  ;;  %vm518_vm2 = vcmask 1043456   ;;  %s668_s17 = sshll.u32 %s1100_s11, 3  ;;  %s695_s22 = sshll.u32 %s1014_s16, 7 }
  0x53   : > { %386 = vmatprep.subr.bf16.mxu0 %v814_v7  ;;  %v240_v31 = vrot.slane %v235_v30, %v239_v29  ;;  %v244_v35 = vrot.slane %v235_v30, %v243_v32  ;;  %s200_s23 = scalar_lea.vmem [#allocation7], %s668_s17  ;;  %s1129_s30 = scalar_lea.hbm %s1175_s3, %s695_s22 }
  0x54   : > { %714 = vmatpush3.bf16.msra.mxu1 %v830_v20  ;;  %v248_v49 = vrot.slane %v235_v30, %v247_v47  ;;  %s579_s25 = sshll.u32 %s200_s23, 4  ;;  %s566_s4 = scalar_lea.sflag [#allocation4], %s1100_s11  ;;  %s1131_s25 = int_to_ptr.vmem [resolvable:$true] %s579_s25 }
  0x55   : > { %715 = vmatprep.subr.bf16.mxu1 %v970_v18  ;;  %s895_s16 = scalar_lea.vmem %s1131_s25, 128  ;;  %p1191_p3 = scmp.ne.s32.totalorder %s1185_s6, 0 }
  0x56   : > { %387 = vmatpush1.bf16.msra.mxu0 %v816_v8  ;;  %p896_p8 = scmp.ne.s32.totalorder %s1131_s25, %s895_s16  ;;  %s972_s8 = smov [#allocation7]  }
  0x57   : > { %388 = vmatprep.subr.bf16.mxu0 %v817_v9  ;;  %s899_s7 = sshll.u32 %s972_s8, 4  ;;  %s900_s7 = int_to_ptr.vmem [resolvable:$false] %s899_s7 }
  0x58   : > { %716 = vmatpush3.bf16.msra.mxu1 %v831_v21  ;;  %p897_p11 = pnand %p896_p8, %p1191_p3  ;;  %s901_s9 = scalar_lea.vmem %s900_s7, 256 }
  0x59   : > { %717 = vmatprep.subr.bf16.mxu1 %v970_v18  ;;  %p902_p10 = scmp.lt.s32.totalorder %s1131_s25, %s900_s7  ;;  %p903_p2 = scmp.lt.s32.totalorder %s901_s9, %s895_s16 }
  0x5a   : > { %389 = vmatpush1.bf16.msra.mxu0 %v819_v10  ;;  %p898_p7 = pneg %p897_p11 }
  0x5b   : > { %390 = vmatprep.subr.bf16.mxu0 %v820_v11  ;;  %p904_p13 = por %p903_p2, %p902_p10 }
  0x5c   : > { %718 = vmatpush3.bf16.msra.mxu1 %v832_v22 }
  0x5d   : > { %719 = vmatprep.subr.bf16.mxu1 %v970_v18  ;;  %p905_p0 = pnand %p904_p13, %p898_p7 }
  0x5e   : > { %391 = vmatpush1.bf16.msra.mxu0 %v822_v12 }
  0x5f   : > { %392 = vmatprep.subr.bf16.mxu0 %v823_v13 }
  0x60   : > { %720 = vmatpush3.bf16.msra.mxu1 %v833_v23 }
  0x61   : > { %721 = vmatprep.subr.bf16.mxu1 %v970_v18 }
  0x62   : > { %393 = vmatpush1.bf16.msra.mxu0 %v825_v14 }
  0x63   : > { %394 = vmatprep.subr.bf16.mxu0 %v826_v15 }
  0x64   : > { %722 = vmatpush3.bf16.msra.mxu1 %v834_v24 }
  0x65   : > { %723 = vmatprep.subr.bf16.mxu1 %v970_v18 }
  0x66   : > { %395 = vmatpush1.bf16.msra.mxu0 %v828_v16 }
  0x67   : > { %731 = vmatprep.subr.bf16.mxu0 %v970_v18 }
  0x68   : > { %724 = vmatpush3.bf16.msra.mxu1 %v835_v25 }
  0x69   : > { %413 = vmatmul.mubr.bf16.vlgmr.msra.gmra.mxu0 %v202_v17  ;;  %725 = vmatprep.subr.bf16.mxu1 %v970_v18 }
  0x6a   : > { %733 = vmatprep.mubr.msk.bf16.mxu0 %vm971_vm0, %v970_v18 }
  0x6c   : > { %726 = vmatpush3.bf16.msra.mxu1 %v836_v26 }
  0x6d   : > { %737 = vmatprep.subr.bf16.mxu1 %v970_v18 }
  0x6f   : > { %728 = vmatmul.mubr.bf16.vlgmr.msra.gmra.mxu1 %v202_v17 }
  0x70   : > { %739 = vmatprep.mubr.msk.bf16.mxu1 %vm971_vm0, %v970_v18 }
 0x129   : > { %v414_v33 = vpop.f32.mrf.mxu0 }
 0x12a   : > { %v415_v34 = vadd.f32 %v414_v33, %v240_v31 }
 0x12b   : > { %v416_v36 = vpop.f32.mrf.mxu0 }
 0x12c   : > { %v462_v37 = vpack.c.bf16 %v415_v34, %v415_v34  ;;  %v417_v39 = vadd.f32 %v416_v36, %v244_v35 }
 0x12d   : > { %v418_v38 = vpop.f32.mrf.mxu0 }
 0x12e   : > { %732 = vmatpush3.bf16.xpose.msra.mxu0 %v462_v37  ;;  %v461_v41 = vpack.c.bf16 %v417_v39, %v417_v39 }
 0x12f   : > { %v419_v40 = vpop.f32.mrf.mxu0  ;;  %v455_v48 = vpop.f32.mrf.mxu1 }
 0x130   : > { %v456_v51 = vadd.f32 %v455_v48, %v248_v49 }
 0x131   : > { %v729_v50 = vpop.f32.mrf.mxu1 }
 0x132   : > { %v514_v53 = vpack.c.bf16 %v456_v51, %v456_v51 }
 0x133   : > { %v458_v52 = vpop.f32.mrf.mxu1 }
 0x134   : > { %v520_v55 = vsel %vm518_vm2, %v514_v53, 0 }
 0x135   : > { %734 = vmatmul.mubr.bf16.vlgmr.msra.gmra.mxu0 %v461_v41  ;;  %v730_v54 = vpop.f32.mrf.mxu1  ;;  %738 = vmatpush3.bf16.msra.mxu1 %v520_v55 }
 0x1f5   : > { %v497_v42 = vpop.f32.mrf.mxu0 }
 0x1f6   : > { %v504_v43 = vsel %vm503_vm1, %v497_v42, -inf }
 0x1f7   : > { %505 = vmax.xlane.f32.xlu0 %v504_v43  ;;  %v735_v44 = vpop.f32.mrf.mxu0 }
 0x1f9   : > { %v500_v45 = vpop.f32.mrf.mxu0 }
 0x1fb   : > { %v736_v46 = vpop.f32.mrf.mxu0 }
 0x280   : > { %v506_v56 = vpop.xlane.xlu0 %505 }
 0x281   : > { %v507_v57 = vsub.f32 %v497_v42, %v506_v56 }
 0x283   : > { %v508_v58 = vmul.f32 1.442695, %v507_v57 }
 0x285   : > { %837 = vpow2.f32 %v508_v58 }
 0x292   : > { %v838_v59 = vpop.eup %837 }
 0x293   : > { %v510_v60 = vsel %vm503_vm1, %v838_v59, 0.0  ;;  %v513_v61 = vpack.c.bf16 %v838_v59, %v838_v59 }
 0x294   : > { %511 = vadd.xlane.f32.xlu0 %v510_v60 }
 0x295   : > { %740 = vmatmul.mubr.msk.bf16.vlgmr.msra.gmra.mxu1 %vm503_vm1, %v513_v61 }
 0x31d   : > { %v512_v62 = vpop.xlane.xlu0 %511 }
 0x31e   : > { %839 = vrcp.f32 %v512_v62 }
 0x32b   : > { %v840_v63 = vpop.eup %839 }
 0x355   : > { %v556_v0 = vpop.f32.mrf.mxu1 }
 0x356   : > { %v563_v1 = vmul.f32 %v840_v63, %v556_v0 }
 0x357   : > { %v741_v2 = vpop.f32.mrf.mxu1 }
 0x358   : > { %564 = vst [vmem:[%s200_s23] sm:$0xff] %v563_v1 }
 0x359   : > { %v559_v3 = vpop.f32.mrf.mxu1 }
 0x35a   : > { %908 = shalt.err (!%p905_p0)
}
 0x35b   : > { %s909_s10 = scalar_lea.hbm %s1129_s30, 128  ;;  %s913_s26 = scalar_lea.hbm %s1175_s3, 256 }
 0x35c   : > { %p910_p5 = scmp.ne.s32.totalorder %s1129_s30, %s909_s10  ;;  %p914_p1 = scmp.lt.s32.totalorder %s1129_s30, %s1175_s3 }
 0x35d   : > { %p915_p4 = scmp.lt.s32.totalorder %s913_s26, %s909_s10 }
 0x35e   : > { %p911_p9 = pnand %p910_p5, %p1191_p3 }
 0x35f   : > { %p916_p6 = por %p915_p4, %p914_p1 }
 0x360   : > { %p912_p12 = pneg %p911_p9 }
 0x362   : > { %p917_p8 = pnand %p916_p6, %p912_p12 }
 0x364   : > { %920 = shalt.err (!%p917_p8)
}
 0x365   : > { %749 = dma.vmem_to_hbm [thread:$0]  (%p1191_p3), %s1131_s25, 128, %s1129_s30, %s566_s4   ;;  %v742_v4 = vpop.f32.mrf.mxu1 }
 0x366 PF: > { %s591_s20 = sand.u32 1, %s951_s12   ;;  %p1192_p11 = scmp.ne.s32.totalorder %s1181_s19, 0 }
 0x367   : > { %p1193_p7 = scmp.ge.s32.totalorder %s963_s15, 2  ;;  %s592_s17 = scalar_lea.sflag [#allocation4], %s591_s20 }
 0x369   : > { %p760_p10 = pnand %p1193_p7, %p1192_p11 }
 0x36b   : > { %p761_p2 = pneg %p760_p10 }
 0x36d   : > { %946 = dma.done.wait (%p761_p2), %s592_s17, 128  }
 0x36e   : > { %948 = vsyncadd (%p761_p2), %s592_s17, 4294967168  ;;  %p17_p13 = scmp.ge.s32.totalorder %s1047_s24, 4   ;;  %s1194_s12 = smov %s955_s13 }
 0x36f   : > { %s1195_s13 = smov %s959_s14  ;;  %s1196_s14 = smov %s1064_s5 }
 0x370   : > { %s1197_s15 = smov %s1047_s24  ;;  %19 = sbr.rel (!%p17_p13) target bundleno = 6 (0x6), region = 81 }
 0x375   :  { %597 = vsyncpa [#allocation3], 1 }
 0x376   :  { %599 = vsyncpa [#allocation3 + $0x1], 1 }
 0x377   :  { %600 = vsyncpa [#allocation6], 1 }
 0x378   :  { %601 = vsyncpa [#allocation4], 1 }
 0x379   :  { %603 = vsyncpa [#allocation4 + $0x1], 1 }

</bundles_post_ra>
